<compile_context>
chip_gen: v5e
topology: v5e:2x2
jax: 0.10.0
libtpu: 0.0.40
codegen_flags: <defaults>
</compile_context>

<pallas_src>
import functools

import jax
import jax.numpy as jnp
from jax import lax
from jax.experimental import pallas as pl
from jax.experimental.pallas import tpu as pltpu


# ---------------------------------------------------------------------------
# Stage 1: fused Q/K/V input projections (lane-dense, weights VMEM-resident).
# ---------------------------------------------------------------------------
def _qkv_proj_kernel(xq_ref, xk_ref, xv_ref, wq_ref, wk_ref, wv_ref,
                     q_ref, k_ref, v_ref):
    # x*_ref : [1, tm, emb]   row tile of the q / k / v inputs
    # w*_ref : [emb, emb]     resident pre-transposed Linear weights
    # out    : [1, tm, emb]   projected rows (head columns grouped h*d:(h+1)*d)
    q_ref[0] = jnp.dot(xq_ref[0], wq_ref[...],
                       preferred_element_type=jnp.float32).astype(q_ref.dtype)
    k_ref[0] = jnp.dot(xk_ref[0], wk_ref[...],
                       preferred_element_type=jnp.float32).astype(k_ref.dtype)
    v_ref[0] = jnp.dot(xv_ref[0], wv_ref[...],
                       preferred_element_type=jnp.float32).astype(v_ref.dtype)


# ---------------------------------------------------------------------------
# Stage 3: output projection (lane-dense, weight VMEM-resident).
# ---------------------------------------------------------------------------
def _row_matmul_kernel(x_ref, w_ref, o_ref):
    # x_ref: [1, tm, emb]; w_ref: [emb, emb] resident; o_ref: [1, tm, emb]
    o_ref[0] = jnp.dot(x_ref[0], w_ref[...],
                       preferred_element_type=jnp.float32).astype(o_ref.dtype)


# ---------------------------------------------------------------------------
# Stage 2: attention core (per batch, per head, per q tile).
# ---------------------------------------------------------------------------
def _attn_core_kernel(q_ref, k_ref, v_ref, mask_ref, ctx_ref, attn_ref, *,
                      tq, mask_resident, approx_recip):
    # q_ref   : [1, 1, tq, d]   this head's query tile (scale already folded in)
    # k_ref   : [1, 1, S,  d]   this head's keys   (fetched once per (b, h))
    # v_ref   : [1, 1, S,  d]   this head's values (fetched once per (b, h))
    # mask_ref: [S, S] int8 (resident) or [tq, S] int8 (tiled); nonzero == masked
    # ctx_ref : [1, 1, tq, d]
    # attn_ref: [1, 1, tq, S]
    cdt = q_ref.dtype
    qh = q_ref[0, 0]
    kh = k_ref[0, 0]
    vh = v_ref[0, 0]

    # scores = Qh @ Kh^T  -> [tq, S] (f32 accumulation on the MXU).
    scores = lax.dot_general(qh, kh, (((1,), (1,)), ((), ())),
                             preferred_element_type=jnp.float32)

    if mask_resident:
        qi = pl.program_id(2)
        row0 = pl.multiple_of(qi * tq, tq)
        mblk = mask_ref[pl.ds(row0, tq), :]
    else:
        mblk = mask_ref[...]
    # Large finite negative instead of -inf (no NaN on fully-masked rows).
    scores = jnp.where(mblk != 0, jnp.float32(-1e30), scores)

    # Numerically stable softmax; row reciprocal + broadcast multiply.
    m = jnp.max(scores, axis=-1, keepdims=True)
    e = jnp.exp(scores - m)
    s = jnp.sum(e, axis=-1, keepdims=True)
    attn = e * pl.reciprocal(s, approx=approx_recip)

    attn_ref[0, 0] = attn.astype(attn_ref.dtype)
    ctx_ref[0, 0] = jnp.dot(attn.astype(cdt), vh,
                            preferred_element_type=jnp.float32).astype(ctx_ref.dtype)


# ---------------------------------------------------------------------------
# Helpers / wrapper
# ---------------------------------------------------------------------------
def _vmem_limit_bytes():
    # v5e/v6e: 128 MiB VMEM per core; v7x: 64 MiB.  Use ~75% as scoped budget.
    try:
        cap = pltpu.get_tpu_info().vmem_capacity_bytes
    except Exception:
        cap = 128 * 1024 * 1024
    return min(int(cap) * 3 // 4, 100 * 1024 * 1024)


def _pick_row_tile(seq, target):
    """Largest row tile <= target that divides seq and satisfies sublane rules."""
    if seq <= target:
        return seq                     # full-extent block is always legal
    t = (target // 8) * 8
    while t >= 8:
        if seq % t == 0:
            return t
        t -= 8
    return seq


def mha_forward(q, k, v, wq, wk, wv, wp, heads, mask=None, block_q=256):
    """q/k/v: [bs, seq, emb].  wq/wk/wv/wp: [emb, emb] PyTorch Linear weights
    (y = x @ W.T).  Returns (out [bs, seq, emb], attn [bs, heads, seq, seq])."""
    bs, seq, emb = q.shape
    k = q if k is None else k
    v = q if v is None else v
    d = emb // heads
    assert heads * d == emb, "emb_dim must be divisible by heads"

    dtype = q.dtype
    scale = 1.0 / (float(d) ** 0.5)

    # Pre-transpose Linear weights on the host; fold softmax 1/sqrt(d) into Wq.
    wq_t = (wq.T.astype(jnp.float32) * scale).astype(dtype)
    wk_t = wk.T.astype(dtype)
    wv_t = wv.T.astype(dtype)
    wp_t = wp.T.astype(dtype)

    vmem_limit = _vmem_limit_bytes()

    # ---- stage 1: Q/K/V projections (hoisted out of the attention loop) ----
    tm = _pick_row_tile(seq, block_q)
    n_m = seq // tm
    row_spec = pl.BlockSpec((1, tm, emb), lambda b, m: (b, m, 0))
    w_resident = pl.BlockSpec((emb, emb), lambda b, m: (0, 0))   # fetched once

    Q, K, V = pl.pallas_call(
        _qkv_proj_kernel,
        out_shape=tuple(jax.ShapeDtypeStruct((bs, seq, emb), dtype)
                        for _ in range(3)),
        grid_spec=pltpu.PrefetchScalarGridSpec(
            num_scalar_prefetch=0,
            grid=(bs, n_m),
            in_specs=[row_spec, row_spec, row_spec,
                      w_resident, w_resident, w_resident],
            out_specs=[row_spec, row_spec, row_spec],
        ),
        compiler_params=pltpu.CompilerParams(
            dimension_semantics=("parallel", "parallel"),
            vmem_limit_bytes=vmem_limit,
        ),
    )(q, k, v, wq_t, wk_t, wv_t)

    # Head-major layout so per-head attention blocks are clean (*, d) slabs
    # (last dims full-extent -> no (8,128) constraints regardless of d).
    def to_heads(t):
        return t.reshape(bs, seq, heads, d).transpose(0, 2, 1, 3)

    Qh, Kh, Vh = to_heads(Q), to_heads(K), to_heads(V)

    # ---- stage 2: attention core ----
    if mask is None:
        mask_i8 = jnp.zeros((seq, seq), jnp.int8)
    else:
        mask_i8 = mask.astype(jnp.int8)

    tq = _pick_row_tile(seq, block_q)
    n_q = seq // tq
    # v7x: make sure the parallel axes expose >= 2 programs (2 TensorCores).
    if bs * n_q < 2 and seq % 2 == 0 and (seq // 2) % 8 == 0:
        tq = seq // 2
        n_q = 2

    mask_resident = (seq * seq) <= (4 * 1024 * 1024)   # int8 mask <= 4 MiB stays in VMEM
    if mask_resident:
        mask_spec = pl.BlockSpec((seq, seq), lambda b, h, qi: (0, 0))
    else:
        mask_spec = pl.BlockSpec((tq, seq), lambda b, h, qi: (qi, 0))

    attn_kernel = functools.partial(
        _attn_core_kernel,
        tq=tq,
        mask_resident=mask_resident,
        approx_recip=(dtype != jnp.float32),   # EUP vrcp only on the low-precision path
    )

    ctx_h, attn = pl.pallas_call(
        attn_kernel,
        out_shape=(jax.ShapeDtypeStruct((bs, heads, seq, d), dtype),
                   jax.ShapeDtypeStruct((bs, heads, seq, seq), dtype)),
        grid_spec=pltpu.PrefetchScalarGridSpec(
            num_scalar_prefetch=0,
            # q innermost -> K/V block index is constant across the inner loop,
            # so the pipeliner fetches each head's K/V only once.
            grid=(bs, heads, n_q),
            in_specs=[
                pl.BlockSpec((1, 1, tq, d), lambda b, h, qi: (b, h, qi, 0)),   # Qh
                pl.BlockSpec((1, 1, seq, d), lambda b, h, qi: (b, h, 0, 0)),   # Kh
                pl.BlockSpec((1, 1, seq, d), lambda b, h, qi: (b, h, 0, 0)),   # Vh
                mask_spec,
            ],
            out_specs=[
                pl.BlockSpec((1, 1, tq, d), lambda b, h, qi: (b, h, qi, 0)),     # ctx
                pl.BlockSpec((1, 1, tq, seq), lambda b, h, qi: (b, h, qi, 0)),   # attn
            ],
        ),
        compiler_params=pltpu.CompilerParams(
            dimension_semantics=("parallel", "parallel", "parallel"),
            vmem_limit_bytes=vmem_limit,
        ),
    )(Qh, Kh, Vh, mask_i8)

    # Back to [bs, seq, emb] (head concat) for the lane-dense output projection.
    ctx = ctx_h.transpose(0, 2, 1, 3).reshape(bs, seq, emb)

    # ---- stage 3: output projection (contraction over emb, weight resident) ----
    out = pl.pallas_call(
        _row_matmul_kernel,
        out_shape=jax.ShapeDtypeStruct((bs, seq, emb), dtype),
        grid_spec=pltpu.PrefetchScalarGridSpec(
            num_scalar_prefetch=0,
            grid=(bs, n_m),
            in_specs=[row_spec, w_resident],
            out_specs=row_spec,
        ),
        compiler_params=pltpu.CompilerParams(
            dimension_semantics=("parallel", "parallel"),
            vmem_limit_bytes=vmem_limit,
        ),
    )(ctx, wp_t)

    return out, attn


def mha_reference(q, k, v, wq, wk, wv, wp, heads, mask=None):
    """Pure-JAX reference mirroring the PyTorch forward."""
    bs, seq, emb = q.shape
    d = emb // heads
    k = q if k is None else k
    v = q if v is None else v
    Q, K, V = q @ wq.T, k @ wk.T, v @ wv.T

    def split(t):  # 'b l (h d) -> (b h) l d'
        return t.reshape(bs, seq, heads, d).transpose(0, 2, 1, 3).reshape(bs * heads, seq, d)

    Qh, Kh, Vh = split(Q), split(K), split(V)
    attn = jnp.einsum('bld,bmd->blm', Qh, Kh) / (d ** 0.5)
    if mask is not None:
        attn = jnp.where(mask[None, :, :], -jnp.inf, attn)
    attn = jax.nn.softmax(attn, axis=-1)
    out = jnp.einsum('blm,bmd->bld', attn, Vh)
    out = out.reshape(bs, heads, seq, d).transpose(0, 2, 1, 3).reshape(bs, seq, emb)
    out = out @ wp.T
    return out, attn.reshape(bs, heads, seq, seq)


if __name__ == "__main__":
    # Small shapes consistent with the module: bs=2, seq=8, emb=32, heads=4.
    bs, seq, emb, heads = 2, 8, 32, 4
    key = jax.random.PRNGKey(0)
    kq, kk, kv, k1, k2, k3, k4 = jax.random.split(key, 7)

    q = jax.random.normal(kq, (bs, seq, emb), jnp.float32)
    k = jax.random.normal(kk, (bs, seq, emb), jnp.float32)
    v = jax.random.normal(kv, (bs, seq, emb), jnp.float32)

    # Deterministic parameter init (nn.Linear-style scale, bias=False).
    w_scale = 1.0 / (emb ** 0.5)
    wq = jax.random.uniform(k1, (emb, emb), jnp.float32, -w_scale, w_scale)
    wk = jax.random.uniform(k2, (emb, emb), jnp.float32, -w_scale, w_scale)
    wv = jax.random.uniform(k3, (emb, emb), jnp.float32, -w_scale, w_scale)
    wp = jax.random.uniform(k4, (emb, emb), jnp.float32, -w_scale, w_scale)

    # Causal boolean mask [seq, seq]: True above the diagonal => masked.
    mask = jnp.triu(jnp.ones((seq, seq), jnp.bool_), k=1)

    # --- f32 run (tight tolerance) ---
    out, attn = mha_forward(q, k, v, wq, wk, wv, wp, heads, mask=mask)
    out = jax.block_until_ready(out)
    attn = jax.block_until_ready(attn)
    out_ref, attn_ref = mha_reference(q, k, v, wq, wk, wv, wp, heads, mask=mask)
    assert jnp.allclose(out, out_ref, atol=1e-4, rtol=1e-4), "f32 out mismatch"
    assert jnp.allclose(attn, attn_ref, atol=1e-5, rtol=1e-5), "f32 attn mismatch"

    # --- bf16 MXU-operand run (f32 accumulation), looser tolerance ---
    qb, kb, vb = (t.astype(jnp.bfloat16) for t in (q, k, v))
    wqb, wkb, wvb, wpb = (w.astype(jnp.bfloat16) for w in (wq, wk, wv, wp))
    out_b, attn_b = mha_forward(qb, kb, vb, wqb, wkb, wvb, wpb, heads, mask=mask)
    out_b = jax.block_until_ready(out_b)
    attn_b = jax.block_until_ready(attn_b)
    out_rb, attn_rb = mha_reference(
        qb.astype(jnp.float32), kb.astype(jnp.float32), vb.astype(jnp.float32),
        wqb.astype(jnp.float32), wkb.astype(jnp.float32),
        wvb.astype(jnp.float32), wpb.astype(jnp.float32), heads, mask=mask)
    assert jnp.allclose(out_b.astype(jnp.float32), out_rb, atol=1e-1, rtol=1e-1), \
        "bf16 out mismatch"
    assert jnp.allclose(attn_b.astype(jnp.float32), attn_rb, atol=5e-2, rtol=5e-2), \
        "bf16 attn mismatch"

    print("KERNEL_OK")
</pallas_src>

<mosaic_0001>
module attributes {stable_mosaic.version = 11 : i64} {
  func.func @_qkv_proj_kernel(%arg0: i32, %arg1: i32, %arg2: memref<1x8x32xf32, #tpu.memory_space<vmem>>, %arg3: memref<1x8x32xf32, #tpu.memory_space<vmem>>, %arg4: memref<1x8x32xf32, #tpu.memory_space<vmem>>, %arg5: memref<32x32xf32, #tpu.memory_space<vmem>>, %arg6: memref<32x32xf32, #tpu.memory_space<vmem>>, %arg7: memref<32x32xf32, #tpu.memory_space<vmem>>, %arg8: memref<1x8x32xf32, #tpu.memory_space<vmem>>, %arg9: memref<1x8x32xf32, #tpu.memory_space<vmem>>, %arg10: memref<1x8x32xf32, #tpu.memory_space<vmem>>) attributes {dimension_semantics = [#tpu.dimension_semantics<parallel>, #tpu.dimension_semantics<parallel>], iteration_bounds = array<i64: 2, 1>, scalar_prefetch = 0 : i64, scratch_operands = 0 : i64, tpu.core_type = #tpu.core_type<tc>, window_params = [{transform_indices = @transform_0, window_bounds = array<i64: 1, 8, 32>}, {transform_indices = @transform_1, window_bounds = array<i64: 1, 8, 32>}, {transform_indices = @transform_2, window_bounds = array<i64: 1, 8, 32>}, {pipeline_mode = #tpu.pipeline_mode<synchronous>, transform_indices = @transform_3, window_bounds = array<i64: 32, 32>}, {pipeline_mode = #tpu.pipeline_mode<synchronous>, transform_indices = @transform_4, window_bounds = array<i64: 32, 32>}, {pipeline_mode = #tpu.pipeline_mode<synchronous>, transform_indices = @transform_5, window_bounds = array<i64: 32, 32>}, {transform_indices = @transform_6, window_bounds = array<i64: 1, 8, 32>}, {transform_indices = @transform_7, window_bounds = array<i64: 1, 8, 32>}, {transform_indices = @transform_8, window_bounds = array<i64: 1, 8, 32>}]} {
    %c0 = arith.constant 0 : index
    %c0_0 = arith.constant 0 : index
    %c0_1 = arith.constant 0 : index
    %0 = vector.load %arg2[%c0, %c0_0, %c0_1] : memref<1x8x32xf32, #tpu.memory_space<vmem>>, vector<1x8x32xf32>
    %1 = vector.shape_cast %0 : vector<1x8x32xf32> to vector<8x32xf32>
    %c0_2 = arith.constant 0 : index
    %c0_3 = arith.constant 0 : index
    %2 = vector.load %arg5[%c0_2, %c0_3] : memref<32x32xf32, #tpu.memory_space<vmem>>, vector<32x32xf32>
    %cst = arith.constant dense<0.000000e+00> : vector<8x32xf32>
    %3 = tpu.matmul %1, %2, %cst {dimension_numbers = #tpu.dot_dimension_numbers<[1], [0], [0], [1], [0, 0, 1, 1], [], []>} : vector<8x32xf32>, vector<32x32xf32>, vector<8x32xf32> -> vector<8x32xf32>
    %c0_4 = arith.constant 0 : index
    %c0_5 = arith.constant 0 : index
    %c0_6 = arith.constant 0 : index
    %4 = vector.load %arg8[%c0_4, %c0_5, %c0_6] : memref<1x8x32xf32, #tpu.memory_space<vmem>>, vector<1x8x32xf32>
    %5 = vector.shape_cast %4 : vector<1x8x32xf32> to vector<8x32xf32>
    %6 = vector.shape_cast %3 : vector<8x32xf32> to vector<1x8x32xf32>
    tpu.vector_store %arg8[%c0_4, %c0_5, %c0_6], %6 {strides = array<i32>} : memref<1x8x32xf32, #tpu.memory_space<vmem>>, vector<1x8x32xf32>,
    %c0_7 = arith.constant 0 : index
    %c0_8 = arith.constant 0 : index
    %c0_9 = arith.constant 0 : index
    %7 = vector.load %arg3[%c0_7, %c0_8, %c0_9] : memref<1x8x32xf32, #tpu.memory_space<vmem>>, vector<1x8x32xf32>
    %8 = vector.shape_cast %7 : vector<1x8x32xf32> to vector<8x32xf32>
    %c0_10 = arith.constant 0 : index
    %c0_11 = arith.constant 0 : index
    %9 = vector.load %arg6[%c0_10, %c0_11] : memref<32x32xf32, #tpu.memory_space<vmem>>, vector<32x32xf32>
    %cst_12 = arith.constant dense<0.000000e+00> : vector<8x32xf32>
    %10 = tpu.matmul %8, %9, %cst_12 {dimension_numbers = #tpu.dot_dimension_numbers<[1], [0], [0], [1], [0, 0, 1, 1], [], []>} : vector<8x32xf32>, vector<32x32xf32>, vector<8x32xf32> -> vector<8x32xf32>
    %c0_13 = arith.constant 0 : index
    %c0_14 = arith.constant 0 : index
    %c0_15 = arith.constant 0 : index
    %11 = vector.load %arg9[%c0_13, %c0_14, %c0_15] : memref<1x8x32xf32, #tpu.memory_space<vmem>>, vector<1x8x32xf32>
    %12 = vector.shape_cast %11 : vector<1x8x32xf32> to vector<8x32xf32>
    %13 = vector.shape_cast %10 : vector<8x32xf32> to vector<1x8x32xf32>
    tpu.vector_store %arg9[%c0_13, %c0_14, %c0_15], %13 {strides = array<i32>} : memref<1x8x32xf32, #tpu.memory_space<vmem>>, vector<1x8x32xf32>,
    %c0_16 = arith.constant 0 : index
    %c0_17 = arith.constant 0 : index
    %c0_18 = arith.constant 0 : index
    %14 = vector.load %arg4[%c0_16, %c0_17, %c0_18] : memref<1x8x32xf32, #tpu.memory_space<vmem>>, vector<1x8x32xf32>
    %15 = vector.shape_cast %14 : vector<1x8x32xf32> to vector<8x32xf32>
    %c0_19 = arith.constant 0 : index
    %c0_20 = arith.constant 0 : index
    %16 = vector.load %arg7[%c0_19, %c0_20] : memref<32x32xf32, #tpu.memory_space<vmem>>, vector<32x32xf32>
    %cst_21 = arith.constant dense<0.000000e+00> : vector<8x32xf32>
    %17 = tpu.matmul %15, %16, %cst_21 {dimension_numbers = #tpu.dot_dimension_numbers<[1], [0], [0], [1], [0, 0, 1, 1], [], []>} : vector<8x32xf32>, vector<32x32xf32>, vector<8x32xf32> -> vector<8x32xf32>
    %c0_22 = arith.constant 0 : index
    %c0_23 = arith.constant 0 : index
    %c0_24 = arith.constant 0 : index
    %18 = vector.load %arg10[%c0_22, %c0_23, %c0_24] : memref<1x8x32xf32, #tpu.memory_space<vmem>>, vector<1x8x32xf32>
    %19 = vector.shape_cast %18 : vector<1x8x32xf32> to vector<8x32xf32>
    %20 = vector.shape_cast %17 : vector<8x32xf32> to vector<1x8x32xf32>
    tpu.vector_store %arg10[%c0_22, %c0_23, %c0_24], %20 {strides = array<i32>} : memref<1x8x32xf32, #tpu.memory_space<vmem>>, vector<1x8x32xf32>,
    return
  }
  func.func @transform_0(%arg0: i32, %arg1: i32) -> (i32, i32, i32) {
    %c0_i32 = arith.constant 0 : i32
    %c0_i32_0 = arith.constant 0 : i32
    return %arg0, %arg1, %c0_i32 : i32, i32, i32
  }
  func.func @transform_1(%arg0: i32, %arg1: i32) -> (i32, i32, i32) {
    %c0_i32 = arith.constant 0 : i32
    %c0_i32_0 = arith.constant 0 : i32
    return %arg0, %arg1, %c0_i32 : i32, i32, i32
  }
  func.func @transform_2(%arg0: i32, %arg1: i32) -> (i32, i32, i32) {
    %c0_i32 = arith.constant 0 : i32
    %c0_i32_0 = arith.constant 0 : i32
    return %arg0, %arg1, %c0_i32 : i32, i32, i32
  }
  func.func @transform_3(%arg0: i32, %arg1: i32) -> (i32, i32) {
    %c0_i32 = arith.constant 0 : i32
    %c0_i32_0 = arith.constant 0 : i32
    %c0_i32_1 = arith.constant 0 : i32
    return %c0_i32, %c0_i32_0 : i32, i32
  }
  func.func @transform_4(%arg0: i32, %arg1: i32) -> (i32, i32) {
    %c0_i32 = arith.constant 0 : i32
    %c0_i32_0 = arith.constant 0 : i32
    %c0_i32_1 = arith.constant 0 : i32
    return %c0_i32, %c0_i32_0 : i32, i32
  }
  func.func @transform_5(%arg0: i32, %arg1: i32) -> (i32, i32) {
    %c0_i32 = arith.constant 0 : i32
    %c0_i32_0 = arith.constant 0 : i32
    %c0_i32_1 = arith.constant 0 : i32
    return %c0_i32, %c0_i32_0 : i32, i32
  }
  func.func @transform_6(%arg0: i32, %arg1: i32) -> (i32, i32, i32) {
    %c0_i32 = arith.constant 0 : i32
    %c0_i32_0 = arith.constant 0 : i32
    return %arg0, %arg1, %c0_i32 : i32, i32, i32
  }
  func.func @transform_7(%arg0: i32, %arg1: i32) -> (i32, i32, i32) {
    %c0_i32 = arith.constant 0 : i32
    %c0_i32_0 = arith.constant 0 : i32
    return %arg0, %arg1, %c0_i32 : i32, i32, i32
  }
  func.func @transform_8(%arg0: i32, %arg1: i32) -> (i32, i32, i32) {
    %c0_i32 = arith.constant 0 : i32
    %c0_i32_0 = arith.constant 0 : i32
    return %arg0, %arg1, %c0_i32 : i32, i32, i32
  }
}

</mosaic_0001>

<bundles_post_ra>
// kernel: tpu_custom_call.1
= control target key start
LH: loop header
LB: loop body
LE: loop exit
PB: predicated region body
PF: predicated region fallthrough
CT: control target
= control target key end

     0   :  { %s1688_s0 = inlined_call_operand.hbm [shape: f32[2,8,32], index: 0, kind: input, shape index: {}]   ;;  %s1689_s1 = inlined_call_operand.hbm [shape: f32[2,8,32], index: 1, kind: input, shape index: {}]   ;;  %s1690_s2 = inlined_call_operand.hbm [shape: f32[2,8,32], index: 2, kind: input, shape index: {}]   ;;  %s1691_s3 = inlined_call_operand.hbm [shape: f32[32,32], index: 3, kind: input, shape index: {}]   ;;  %s1692_s4 = inlined_call_operand.hbm [shape: f32[32,32], index: 4, kind: input, shape index: {}]   ;;  %s1693_s5 = inlined_call_operand.hbm [shape: f32[32,32], index: 5, kind: input, shape index: {}]   ;;  %s1694_s6 = inlined_call_operand.hbm [shape: f32[2,8,32], index: 6, kind: output, shape index: {0}]   ;;  %s1695_s7 = inlined_call_operand.hbm [shape: f32[2,8,32], index: 7, kind: output, shape index: {1}]   ;;  %s1696_s8 = inlined_call_operand.hbm [shape: f32[2,8,32], index: 8, kind: output, shape index: {2}]  }
   0x1   :  { %1712 = sst [smem:[#allocation30_spill]] %s1689_s1 }
   0x2   :  { %1713 = sst [smem:[#allocation31_spill]] %s1691_s3 }
   0x3   :  { %1714 = sst [smem:[#allocation32_spill]] %s1692_s4 }
   0x4   :  { %1715 = sst [smem:[#allocation33_spill]] %s1693_s5 }
   0x5   :  { %1716 = sst [smem:[#allocation34_spill]] %s1696_s8 }
   0x6   :  { %14 = vsyncpa [#allocation3], 0 }
   0x7   :  { %16 = vsyncpa [#allocation3 + $0x1], 0 }
   0x8   :  { %17 = vsyncpa [#allocation6], 0 }
   0x9   :  { %19 = vsyncpa [#allocation6 + $0x1], 0 }
   0xa   :  { %20 = vsyncpa [#allocation9], 0 }
   0xb   :  { %21 = vsyncpa [#allocation12], 0 }
   0xc   :  { %22 = vsyncpa [#allocation4], 0 }
   0xd   :  { %24 = vsyncpa [#allocation4 + $0x1], 0 }
   0xe   :  { %25 = vsyncpa [#allocation15], 0 }
   0xf   :  { %27 = vsyncpa [#allocation15 + $0x1], 0  ;;  %s1392_s27 = smov 0   ;;  %s1394_s28 = smov 0  }
  0x10   :  { %s1396_s29 = smov 0   ;;  %s1398_s30 = smov 0  }
  0x11   :  { %s1400_s9 = smov 0   ;;  %s1402_s10 = smov 0  }
  0x12 LB: > { %1717 = sst [smem:[#allocation23_spill]] %s1320_s27  ;;  %s1423_s11 = sadd.s32 4294967295, %s1340_s10   ;;  %s1340_s10 = sphi %s1402_s10, %s33_s10   ;;  %s1336_s9 = sphi %s1400_s9, %s1746_s9   ;;  %s1332_s30 = sphi %s1398_s30, %s1745_s30   ;;  %s1328_s29 = sphi %s1396_s29, %s1749_s29   ;;  %s1324_s28 = sphi %s1394_s28, %s1748_s28   ;;  %s1320_s27 = sphi %s1392_s27, %s1747_s27  }
  0x13   : > { %1718 = sst [smem:[#allocation24_spill]] %s1336_s9  ;;  %p859_p0 = scmp.ge.s32.totalorder %s1340_s10, 1 }
  0x14   : > { %1719 = sst [smem:[#allocation25_spill]] %s1340_s10  ;;  %p68_p1 = scmp.eq.s32.totalorder %s1423_s11, 0 }
  0x15   : > { %p281_p2 = scmp.lt.s32.totalorder %s1340_s10, 3  ;;  %s1720_s3 = sld [smem:[#allocation31_spill]] }
  0x16   : > { %s1342_s16 = smov [#allocation8]   ;;  %p863_p6 = scmp.ge.s32.totalorder %s1340_s10, 2 }
  0x17   : > { %p1431_p3 = pnand %p859_p0, %p281_p2  ;;  %s294_s17 = sshll.u32 %s1342_s16, 4  ;;  %s295_s17 = int_to_ptr.vmem [resolvable:$true] %s294_s17 }
  0x18   : > { %s1697_s19 = smov 128   ;;  %s1700_s20 = smov 8  }
  0x19   : > { %p915_p4 = pneg %p1431_p3  ;;  %s1699_s21 = sadd.s32 4294967294, %s1340_s10  }
  0x1a   : > { %s45_s22 = sadd.s32 1, %s1336_s9  ;;  %s54_s23 = sadd.s32 1, %s1328_s29 }
  0x1b   : > { %s292_s14 = sshll.u32 %s1720_s3, 4  ;;  %p1439_p5 = pnand %p915_p4, %p68_p1  ;;  %s293_s14 = int_to_ptr.hbm [resolvable:$true] %s292_s14 }
  0x1c   : > { %p47_p7 = scmp.ge.s32.totalorder %s45_s22, 2  ;;  %p61_p8 = scmp.ne.s32.totalorder %s1328_s29, %s1324_s28 }
  0x1d   : > { %918 = dma.hbm_to_vmem [thread:$0]  (!%p1439_p5), %s293_s14, 512, %s295_s17, [#allocation9], %s1697_s19, %s1697_s19, %s1700_s20  }
  0x1e   : > { %p62_p9 = scmp.eq.s32.totalorder %s1340_s10, 0  ;;  %p67_p10 = scmp.ne.s32.totalorder %s1324_s28, %s1320_s27 }
  0x1f   : > { %s1751_s22 = smov (%p47_p7, %s45_s22), 0  ;;  %p212_p13 = scmp.eq.s32.totalorder %s1423_s11, 1 }
  0x20   : > { %1723 = sst [smem:[#allocation26_spill]] %s1751_s22  ;;  %p1459_p11 = por %p62_p9, %p61_p8 }
  0x21   : > { %p1465_p12 = por %p68_p1, %p67_p10  ;;  %s49_s26 = ssub.s32 %s1336_s9, %s1751_s22 }
  0x22   : > { %p52_p0 = scmp.eq.s32.totalorder %s49_s26, 0  ;;  %p218_p2 = scmp.eq.s32.totalorder %s1699_s21, 1 }
  0x23   : > { %p1474_p4 = por %p212_p13, %p61_p8  ;;  %p948_p7 = scmp.lt.s32.totalorder %s1340_s10, 2 }
  0x24   : > { %s1480_s13 = scalar_select %p52_p0, %s1328_s29, %s54_s23  }
  0x25   : > { %s1726_s12 = scalar_select %p1474_p4, 1, 0 }
  0x26   : > { %1728 = sst [smem:[#allocation28_spill]] %s1480_s13  ;;  %p1482_p9 = por %p218_p2, %p67_p10 }
  0x27   : > { %1727 = sst [smem:[#allocation27_spill]] %s1726_s12  ;;  %s1703_s16 = sand.u32 1, %s1328_s29  }
  0x28   : > { %s1729_s14 = scalar_select %p1482_p9, 1, 0 }
  0x29   : > { %s1489_s17 = sshll.u32 %s1703_s16, 3  ;;  %s1492_s19 = sshll.u32 %s1336_s9, 3 }
  0x2a   : > { %1730 = sst [smem:[#allocation29_spill]] %s1729_s14  ;;  %p1496_p8 = pnand %p948_p7, %p1459_p11 }
  0x2b   : > { %s356_s23 = sand.u32 1, %s1340_s10   ;;  %s1732_s1 = sld [smem:[#allocation30_spill]] }
  0x2c   : > { %s360_s13 = scalar_lea.vmem [#allocation5], %s1489_s17  ;;  %s1506_s24 = scalar_lea.sflag [#allocation6], %s356_s23 }
  0x2d   : > { %s369_s16 = sshll.u32 %s360_s13, 4  ;;  %s1733_s4 = sld [smem:[#allocation32_spill]]  ;;  %s370_s16 = int_to_ptr.vmem [resolvable:$true] %s369_s16 }
  0x2e   : > { %s1345_s20 = smov [#allocation10]   ;;  %s1734_s5 = sld [smem:[#allocation33_spill]] }
  0x2f   : > { %s1735_s23 = smov 8   ;;  %s1736_s27 = smov 128  }
  0x30   : > { %s1346_s9 = smov [#allocation11]   ;;  %s340_s21 = scalar_lea.vmem [#allocation2], %s1489_s17 }
  0x31   : > { %s365_s3 = scalar_lea.hbm %s1732_s1, %s1492_s19  ;;  %s349_s13 = sshll.u32 %s340_s21, 4  ;;  %s350_s13 = int_to_ptr.vmem [resolvable:$true] %s349_s13 }
  0x32   : > { %s367_s22 = sshll.u32 %s365_s3, 4  ;;  %s308_s3 = sshll.u32 %s1345_s20, 4  ;;  %s368_s22 = int_to_ptr.hbm [resolvable:$true] %s367_s22  ;;  %s309_s3 = int_to_ptr.vmem [resolvable:$true] %s308_s3 }
  0x33   : > { %931 = dma.hbm_to_vmem [thread:$0]  (!%p1496_p8), %s368_s22, 128, %s370_s16, %s1506_s24  }
  0x34   : > { %s306_s10 = sshll.u32 %s1733_s4, 4  ;;  %s320_s1 = sshll.u32 %s1734_s5, 4  ;;  %s307_s10 = int_to_ptr.hbm [resolvable:$true] %s306_s10  ;;  %s321_s1 = int_to_ptr.hbm [resolvable:$true] %s320_s1 }
  0x35   : > { %921 = dma.hbm_to_vmem [thread:$0]  (!%p1439_p5), %s307_s10, 512, %s309_s3, [#allocation9], %s1736_s27, %s1736_s27, %s1735_s23  }
  0x36   : > { %s322_s22 = sshll.u32 %s1346_s9, 4  ;;  %s345_s20 = scalar_lea.hbm %s1688_s0, %s1492_s19  ;;  %s323_s22 = int_to_ptr.vmem [resolvable:$true] %s322_s22 }
  0x37   : > { %924 = dma.hbm_to_vmem [thread:$0]  (!%p1439_p5), %s321_s1, 512, %s323_s22, [#allocation12], %s1736_s27, %s1736_s27, %s1735_s23  }
  0x38   : > { %s347_s4 = sshll.u32 %s345_s20, 4  ;;  %s1737_s10 = sand.u32 1, %s1328_s29   ;;  %s348_s4 = int_to_ptr.hbm [resolvable:$true] %s347_s4 }
  0x39   : > { %s337_s3 = scalar_lea.sflag [#allocation3], %s1737_s10  ;;  %s385_s5 = scalar_lea.hbm %s1690_s2, %s1492_s19 }
  0x3a   : > { %928 = dma.hbm_to_vmem [thread:$0]  (!%p1496_p8), %s348_s4, 128, %s350_s13, %s337_s3  }
  0x3b   : > { %s380_s12 = scalar_lea.vmem [#allocation7], %s1489_s17  ;;  %s387_s1 = sshll.u32 %s385_s5, 4  ;;  %s388_s1 = int_to_ptr.hbm [resolvable:$true] %s387_s1 }
  0x3c   : > { %s389_s8 = sshll.u32 %s380_s12, 4  ;;  %398 = sbr.rel (%p1431_p3) target bundleno = 236 (0xec), region = 44  ;;  %s390_s8 = int_to_ptr.vmem [resolvable:$true] %s389_s8 }
  0x3d   : > { %934 = dma.hbm_to_vmem [thread:$0]  (!%p1496_p8), %s388_s1, 128, %s390_s8, %s1506_s24  }
  0x3e   : > { %s1547_s27 = sand.u32 (!%p1431_p3), 1, %s1324_s28  }
  0x3f   : > { %s1550_s4 = sshll.u32 (!%p1431_p3), %s1547_s27, 3  ;;  %s401_s19 = scalar_lea.sflag (!%p1431_p3), [#allocation3], %s1547_s27 }
  0x40   : > { %s404_s17 = scalar_lea.vmem (!%p1431_p3), [#allocation2], %s1550_s4 }
  0x41   : > { %1295 = dma.done.wait (%p1465_p12), %s401_s19, 128  }
  0x42   : > { %1297 = vsyncadd (%p1465_p12), %s401_s19, 4294967168  ;;  %s410_s5 = sand.u32 1, %s1423_s11   ;;  %s414_s15 = scalar_lea.vmem [#allocation5], %s1550_s4 }
  0x43   : > { %s411_s8 = scalar_lea.sflag [#allocation6], %s410_s5 }
  0x44   : > { %1299 = dma.done.wait (%p1465_p12), %s411_s8, 256  }
  0x45   : > { %1301 = vsyncadd (%p1465_p12), %s411_s8, 4294967040  ;;  %s424_s12 = scalar_lea.vmem [#allocation7], %s1550_s4 }
  0x46   : > { %1303 = dma.done.wait (%p68_p1), [#allocation9], 1024  }
  0x47   : > { %1305 = vsyncadd (%p68_p1), [#allocation9], 4294966272 }
  0x48   : > { %1307 = dma.done.wait (%p68_p1), [#allocation12], 512  }
  0x49   : > { %1309 = vsyncadd (%p68_p1), [#allocation12], 4294966784  ;;  %v556_v0 = vld [vmem:[#allocation11 + $0x18] sm:$0xff]  ;;  %v555_v1 = vld [vmem:[#allocation11 + $0x10] sm:$0xff]  ;;  %vm498_vm0 = vcmask 261120   ;;  %s886_s25 = sshll.u32 %s1332_s30, 3 }
  0x4a   : > { %572 = vmatpush.msra.mxu2 %v556_v0  ;;  %v527_v2 = vld [vmem:[#allocation10 + $0x18] sm:$0xff]  ;;  %v554_v4 = vld [vmem:[#allocation11 + $0x8] sm:$0xff]  ;;  %v526_v5 = vld [vmem:[#allocation10 + $0x10] sm:$0xff]  ;;  %s618_s23 = scalar_lea.hbm %s1695_s7, %s886_s25  ;;  %s603_s16 = scalar_lea.hbm %s1694_s6, %s886_s25 }
  0x4b   : > { %v497_v3 = vld [vmem:[#allocation8 + $0x18] sm:$0xff]  ;;  %543 = vmatpush.msra.mxu1 %v527_v2  ;;  %v496_v6 = vld [vmem:[#allocation8 + $0x10] sm:$0xff]  ;;  %v525_v7 = vld [vmem:[#allocation10 + $0x8] sm:$0xff]  ;;  %s485_s20 = scalar_lea.vmem [#allocation14], %s1550_s4  ;;  %s1592_s13 = sshll.u32 %s618_s23, 4  ;;  %s623_s13 = int_to_ptr.hbm [resolvable:$true] %s1592_s13 }
  0x4c   : > { %514 = vmatpush.msra.mxu0 %v497_v3  ;;  %573 = vmatpush.msra.mxu2 %v555_v1  ;;  %v495_v8 = vld [vmem:[#allocation8 + $0x8] sm:$0xff]  ;;  %v553_v9 = vld [vmem:[#allocation11] sm:$0xff]  ;;  %v552_v10 = vld [vmem:[%s424_s12] sm:$0xff]  ;;  %s1590_s21 = sshll.u32 %s485_s20, 4  ;;  %s478_s10 = scalar_lea.vmem [#allocation13], %s1550_s4  ;;  %s621_s21 = int_to_ptr.vmem [resolvable:$true] %s1590_s21 }
  0x4d   : > { %544 = vmatpush.msra.mxu1 %v526_v5  ;;  %v524_v11 = vld [vmem:[#allocation10] sm:$0xff]  ;;  %v493_v14 = vld [vmem:[%s404_s17] sm:$0xff]  ;;  %s1595_s30 = sshll.u32 %s478_s10, 4  ;;  %s1597_s3 = sshll.u32 %s603_s16, 4  ;;  %s606_s30 = int_to_ptr.vmem [resolvable:$true] %s1595_s30  ;;  %s608_s3 = int_to_ptr.hbm [resolvable:$true] %s1597_s3 }
  0x4e   : > { %515 = vmatpush.msra.mxu0 %v496_v6  ;;  %574 = vmatpush.msra.mxu2 %v554_v4  ;;  %v494_v12 = vld [vmem:[#allocation8] sm:$0xff]  ;;  %s1738_s1 = sld [smem:[#allocation34_spill]]  ;;  %s492_s8 = scalar_lea.vmem [#allocation16], %s1550_s4 }
  0x4f   : > { %545 = vmatpush.msra.mxu1 %v525_v7  ;;  %v523_v13 = vld [vmem:[%s414_s15] sm:$0xff]  ;;  %s1610_s15 = sshll.u32 %s492_s8, 4  ;;  %s1617_s26 = scalar_lea.sflag [#allocation15], %s410_s5  ;;  %s636_s15 = int_to_ptr.vmem [resolvable:$true] %s1610_s15 }
  0x50   : > { %516 = vmatpush.msra.mxu0 %v495_v8  ;;  %575 = vmatpush.msra.mxu2 %v553_v9  ;;  %s1206_s14 = scalar_lea.hbm %s1695_s7, 16 }
  0x51   : > { %882 = vmatmul.msk.f32.vlgmr.msra.gmra.mxu2 %vm498_vm0, %v552_v10  ;;  %546 = vmatpush.msra.mxu1 %v524_v11 }
  0x52   : > { %517 = vmatpush.msra.mxu0 %v494_v12  ;;  %881 = vmatmul.msk.f32.vlgmr.msra.gmra.mxu1 %vm498_vm0, %v523_v13 }
  0x53   : > { %880 = vmatmul.msk.f32.vlgmr.msra.gmra.mxu0 %vm498_vm0, %v493_v14 }
  0x54   : > { %s633_s19 = scalar_lea.hbm %s1738_s1, %s886_s25  ;;  %s1200_s25 = sshra.s32 %s623_s13, 4  ;;  %s1201_s25 = int_to_ptr.hbm [resolvable:$true] %s1200_s25 }
  0x55   : > { %s1612_s12 = sshll.u32 %s633_s19, 4  ;;  %s1202_s24 = scalar_lea.hbm %s1201_s25, 8  ;;  %s638_s12 = int_to_ptr.hbm [resolvable:$true] %s1612_s12 }
  0x56   : > { %p1203_p1 = scmp.ne.s32.totalorder %s1201_s25, %s1202_s24  ;;  %p1207_p10 = scmp.lt.s32.totalorder %s1201_s25, %s1695_s7 }
  0x57   : > { %p1208_p11 = scmp.lt.s32.totalorder %s1206_s14, %s1202_s24 }
  0x58   : > { %p1204_p3 = pnand %p1203_p1, %p1474_p4 }
  0x59   : > { %p1209_p12 = por %p1208_p11, %p1207_p10 }
  0x5a   : > { %p1205_p5 = pneg %p1204_p3 }
  0x5c   : > { %p1210_p13 = pnand %p1209_p12, %p1205_p5 }
  0xcf   : > { %v548_v15 = vpop.f32.mrf.mxu1 }
  0xd0   : > { %551 = vst.msk [vmem:[%s485_s20] sm:$0xff] %vm498_vm0, %v548_v15  ;;  %v519_v16 = vpop.f32.mrf.mxu0 }
  0xd1   : > { %522 = vst.msk [vmem:[%s478_s10] sm:$0xff] %vm498_vm0, %v519_v16 }
  0xd2   : > { %1213 = shalt.err (!%p1210_p13)
}
  0xd3   : > { %910 = dma.vmem_to_hbm [thread:$0]  (%p1474_p4), %s621_s21, 128, %s623_s13, %s1617_s26  }
  0xd4   : > { %s582_s11 = scalar_lea.sflag [#allocation4], %s1547_s27  ;;  %s1228_s5 = sshra.s32 %s608_s3, 4  ;;  %s1229_s5 = int_to_ptr.hbm [resolvable:$true] %s1228_s5 }
  0xd5   : > { %s1230_s10 = scalar_lea.hbm %s1229_s5, 8  ;;  %s1234_s19 = scalar_lea.hbm %s1694_s6, 16 }
  0xd6   : > { %p1231_p0 = scmp.ne.s32.totalorder %s1229_s5, %s1230_s10  ;;  %p1235_p8 = scmp.lt.s32.totalorder %s1229_s5, %s1694_s6 }
  0xd7   : > { %p1236_p1 = scmp.lt.s32.totalorder %s1234_s19, %s1230_s10 }
  0xd8   : > { %p1232_p2 = pnand %p1231_p0, %p1474_p4 }
  0xd9   : > { %p1237_p3 = por %p1236_p1, %p1235_p8 }
  0xda   : > { %p1233_p7 = pneg %p1232_p2 }
  0xdc   : > { %p1238_p5 = pnand %p1237_p3, %p1233_p7 }
  0xde   : > { %1241 = shalt.err (!%p1238_p5)
}
  0xdf   : > { %909 = dma.vmem_to_hbm [thread:$0]  (%p1474_p4), %s606_s30, 128, %s608_s3, %s582_s11   ;;  %v577_v17 = vpop.f32.mrf.mxu2 }
  0xe0   : > { %580 = vst.msk [vmem:[%s492_s8] sm:$0xff] %vm498_vm0, %v577_v17  ;;  %s1256_s27 = sshra.s32 %s638_s12, 4  ;;  %s1262_s22 = scalar_lea.hbm %s1738_s1, 16  ;;  %s1257_s27 = int_to_ptr.hbm [resolvable:$true] %s1256_s27 }
  0xe1   : > { %s1258_s21 = scalar_lea.hbm %s1257_s27, 8  ;;  %p1263_p13 = scmp.lt.s32.totalorder %s1257_s27, %s1738_s1 }
  0xe2   : > { %p1259_p10 = scmp.ne.s32.totalorder %s1257_s27, %s1258_s21  ;;  %p1264_p0 = scmp.lt.s32.totalorder %s1262_s22, %s1258_s21 }
  0xe4   : > { %p1260_p11 = pnand %p1259_p10, %p1474_p4  ;;  %p1265_p2 = por %p1264_p0, %p1263_p13 }
  0xe6   : > { %p1261_p12 = pneg %p1260_p11 }
  0xe8   : > { %p1266_p7 = pnand %p1265_p2, %p1261_p12 }
  0xea   : > { %1269 = shalt.err (!%p1266_p7)
}
  0xeb   : > { %911 = dma.vmem_to_hbm [thread:$0]  (%p1474_p4), %s636_s15, 128, %s638_s12, %s1617_s26  }
  0xec PF: > { %s1740_s4 = sld [smem:[#allocation23_spill]]  ;;  %p936_p8 = pnand %p863_p6, %p1482_p9 }
  0xed   : > { %s1742_s3 = sld [smem:[#allocation25_spill]] }
  0xee   : > { %p937_p1 = pneg %p936_p8 }
  0xf2   : > { %s649_s8 = sand.u32 1, %s1740_s4  }
  0xf3   : > { %s650_s20 = scalar_lea.sflag [#allocation4], %s649_s8 }
  0xf4   : > { %1311 = dma.done.wait (%p937_p1), %s650_s20, 128  }
  0xf5   : > { %1313 = vsyncadd (%p937_p1), %s650_s20, 4294967168  ;;  %s1743_s11 = sadd.s32 4294967294, %s1742_s3  }
  0xf6   : > { %s659_s5 = sand.u32 1, %s1743_s11  }
  0xf7   : > { %s660_s10 = scalar_lea.sflag [#allocation15], %s659_s5 }
  0xf8   : > { %1315 = dma.done.wait (%p937_p1), %s660_s10, 256  }
  0xf9   : > { %1317 = vsyncadd (%p937_p1), %s660_s10, 4294967040  ;;  %s33_s10 = sadd.s32 1, %s1742_s3   ;;  %s1744_s17 = sld [smem:[#allocation28_spill]] }
  0xfa   : > { %p30_p4 = scmp.ge.s32.totalorder %s33_s10, 4   ;;  %s1745_s30 = sld [smem:[#allocation24_spill]] }
  0xfb   : > { %s1746_s9 = sld [smem:[#allocation26_spill]]  ;;  %s1747_s27 = smov %s1324_s28 }
  0xfc   : > { %s1748_s28 = smov %s1328_s29  ;;  %32 = sbr.rel (!%p30_p4) target bundleno = 18 (0x12), region = 157 }
  0xff   : > { %s1749_s29 = smov %s1744_s17 }
 0x101   :  { %676 = vsyncpa [#allocation3], 1 }
 0x102   :  { %678 = vsyncpa [#allocation3 + $0x1], 1 }
 0x103   :  { %679 = vsyncpa [#allocation6], 1 }
 0x104   :  { %681 = vsyncpa [#allocation6 + $0x1], 1 }
 0x105   :  { %682 = vsyncpa [#allocation9], 1 }
 0x106   :  { %683 = vsyncpa [#allocation12], 1 }
 0x107   :  { %684 = vsyncpa [#allocation4], 1 }
 0x108   :  { %686 = vsyncpa [#allocation4 + $0x1], 1 }
 0x109   :  { %687 = vsyncpa [#allocation15], 1 }
 0x10a   :  { %689 = vsyncpa [#allocation15 + $0x1], 1 }

</bundles_post_ra>
